<compile_context>
chip_gen: v7x
topology: tpu7x:2x2x1
jax: 0.10.0
libtpu: 0.0.40
codegen_flags: <defaults>
</compile_context>

<pallas_src>
import jax
import jax.numpy as jnp
from jax.experimental import pallas as pl
from jax.experimental.pallas import tpu as pltpu

# ----- module config (small synthetic shapes consistent with the forward) ----
D_MODEL = 32          # d_model (small synthetic size)
KEYBOARD = 8          # keyboard_actions
MOUSE_ACT = 3         # mouse_actions
MOUSE_EVT = 4         # mouse_events
MOUSE_POS = 2         # mouse_positions
OUT_TOT = KEYBOARD + MOUSE_ACT + MOUSE_EVT + MOUSE_POS   # 17 fused logits
OUT_DIM = KEYBOARD + 1 + 1 + MOUSE_POS                   # 12 final features

BATCH = 2
SEQ = 8


def _argmax_of_seq_softmax(z):
    """z: (S, C) logits for one batch.

    torch semantics: softmax over the sequence axis (dim=1 of (B,S,C)), then
    argmax over the class axis with keepdim, float result, first-max tie-break.

    Done in log-domain: log-softmax(z)[s, c] = z[s, c] - logsumexp_s(z[:, c]).
    log is strictly monotone, so the class-argmax of the log-softmax equals the
    class-argmax of the softmax exactly, without materializing exp + divide.
    """
    c = z.shape[-1]
    m = jnp.max(z, axis=0, keepdims=True)                               # (1, C)
    lse = m + jnp.log(jnp.sum(jnp.exp(z - m), axis=0, keepdims=True))   # (1, C)
    score = z - lse                                                     # (S, C)
    idx = jax.lax.broadcasted_iota(jnp.int32, score.shape, dimension=1)
    mx = jnp.max(score, axis=1, keepdims=True)
    sel = jnp.where(score == mx, idx, c)
    return jnp.min(sel, axis=1, keepdims=True).astype(jnp.float32)      # (S, 1)


def policy_forward(x, w_all, b_all):
    B, S, D = x.shape
    x2 = x.reshape(B * S, D)   # free reshape in the wrapper; kernel stays 2-D

    def kernel(x_ref, w_ref, b_ref, o_ref):
        # single fused MXU matmul over all B*S rows + bias
        logits = jnp.dot(x_ref[...], w_ref[...],
                         preferred_element_type=jnp.float32) + b_ref[...]

        # keyboard head: sigmoid(x) > 0.5  <=>  x > 0
        o_ref[:, 0:KEYBOARD] = (logits[:, 0:KEYBOARD] > 0.0).astype(jnp.float32)

        # mouse position head: plain linear output
        o_ref[:, KEYBOARD + 2:OUT_DIM] = (
            logits[:, KEYBOARD + MOUSE_ACT + MOUSE_EVT:OUT_TOT])

        # mouse action / event heads: softmax over the sequence axis is
        # per-batch, so unroll the (tiny, static) batch loop with static
        # row slices; results are written straight into the output lanes.
        for b in range(B):
            r0, r1 = b * S, (b + 1) * S
            za = logits[r0:r1, KEYBOARD:KEYBOARD + MOUSE_ACT]            # (S, 3)
            ze = logits[r0:r1, KEYBOARD + MOUSE_ACT:
                        KEYBOARD + MOUSE_ACT + MOUSE_EVT]                # (S, 4)
            o_ref[r0:r1, KEYBOARD:KEYBOARD + 1] = _argmax_of_seq_softmax(za)
            o_ref[r0:r1, KEYBOARD + 1:KEYBOARD + 2] = _argmax_of_seq_softmax(ze)

    out2 = pl.pallas_call(
        kernel,
        out_shape=jax.ShapeDtypeStruct((B * S, OUT_DIM), jnp.float32),
        in_specs=[
            pl.BlockSpec(memory_space=pltpu.MemorySpace.VMEM),
            pl.BlockSpec(memory_space=pltpu.MemorySpace.VMEM),
            pl.BlockSpec(memory_space=pltpu.MemorySpace.VMEM),
        ],
        out_specs=pl.BlockSpec(memory_space=pltpu.MemorySpace.VMEM),
    )(x2, w_all, b_all)
    return out2.reshape(B, S, OUT_DIM)


def policy_reference(x, w_all, b_all):
    # pure-JAX reference with the original PyTorch semantics
    logits = jnp.einsum("bsd,do->bso", x, w_all) + b_all[None, :, :]
    kb_l = logits[..., 0:KEYBOARD]
    ma_l = logits[..., KEYBOARD:KEYBOARD + MOUSE_ACT]
    me_l = logits[..., KEYBOARD + MOUSE_ACT:KEYBOARD + MOUSE_ACT + MOUSE_EVT]
    mp = logits[..., KEYBOARD + MOUSE_ACT + MOUSE_EVT:]
    kb = (jax.nn.sigmoid(kb_l) > 0.5).astype(jnp.float32)
    ma_p = jax.nn.softmax(ma_l, axis=1)
    me_p = jax.nn.softmax(me_l, axis=1)
    ma = jnp.argmax(ma_p, axis=2, keepdims=True).astype(jnp.float32)
    me = jnp.argmax(me_p, axis=2, keepdims=True).astype(jnp.float32)
    return jnp.concatenate([kb, ma, me, mp], axis=2)


if __name__ == "__main__":
    key = jax.random.PRNGKey(0)
    kx, kw, kb = jax.random.split(key, 3)

    # deterministic synthetic parameters (in-features x out-features layout)
    x = jax.random.normal(kx, (BATCH, SEQ, D_MODEL), dtype=jnp.float32)
    w_all = jax.random.normal(kw, (D_MODEL, OUT_TOT), dtype=jnp.float32) * 0.1
    b_all = jax.random.normal(kb, (1, OUT_TOT), dtype=jnp.float32) * 0.1

    out = policy_forward(x, w_all, b_all)
    out = jax.block_until_ready(out)

    ref = policy_reference(x, w_all, b_all)
    assert out.shape == (BATCH, SEQ, OUT_DIM), out.shape
    assert jnp.allclose(out, ref, atol=1e-3), "mismatch vs pure-JAX reference"

    print("KERNEL_OK")
</pallas_src>

<mosaic_0001>
module attributes {stable_mosaic.version = 11 : i64} {
  func.func @kernel(%arg0: memref<16x32xf32, #tpu.memory_space<vmem>>, %arg1: memref<32x17xf32, #tpu.memory_space<vmem>>, %arg2: memref<1x17xf32, #tpu.memory_space<vmem>>, %arg3: memref<16x12xf32, #tpu.memory_space<vmem>>) attributes {dimension_semantics = [], scalar_prefetch = 0 : i64, scratch_operands = 0 : i64, tpu.core_type = #tpu.core_type<tc>} {
    %c0 = arith.constant 0 : index
    %c0_0 = arith.constant 0 : index
    %0 = vector.load %arg0[%c0, %c0_0] : memref<16x32xf32, #tpu.memory_space<vmem>>, vector<16x32xf32>
    %c0_1 = arith.constant 0 : index
    %c0_2 = arith.constant 0 : index
    %1 = vector.load %arg1[%c0_1, %c0_2] : memref<32x17xf32, #tpu.memory_space<vmem>>, vector<32x17xf32>
    %cst = arith.constant dense<0.000000e+00> : vector<16x17xf32>
    %2 = tpu.matmul %0, %1, %cst {dimension_numbers = #tpu.dot_dimension_numbers<[1], [0], [0], [1], [0, 0, 1, 1], [], []>} : vector<16x32xf32>, vector<32x17xf32>, vector<16x17xf32> -> vector<16x17xf32>
    %c0_3 = arith.constant 0 : index
    %c0_4 = arith.constant 0 : index
    %3 = vector.load %arg2[%c0_3, %c0_4] : memref<1x17xf32, #tpu.memory_space<vmem>>, vector<1x17xf32>
    %4 = vector.broadcast %3 : vector<1x17xf32> to vector<16x17xf32>
    %5 = arith.addf %2, %4 : vector<16x17xf32>
    %6 = vector.extract_strided_slice %5 {offsets = [0, 0], sizes = [16, 8], strides = [1, 1]} : vector<16x17xf32> to vector<16x8xf32>
    %cst_5 = arith.constant 0.000000e+00 : f32
    %7 = vector.broadcast %cst_5 : f32 to vector<16x8xf32>
    %8 = arith.cmpf ogt, %6, %7 : vector<16x8xf32>
    %9 = arith.extui %8 : vector<16x8xi1> to vector<16x8xi32>
    %10 = arith.sitofp %9 : vector<16x8xi32> to vector<16x8xf32>
    %c0_6 = arith.constant 0 : index
    %c0_7 = arith.constant 0 : index
    %11 = vector.load %arg3[%c0_6, %c0_7] : memref<16x12xf32, #tpu.memory_space<vmem>>, vector<16x8xf32>
    tpu.vector_store %arg3[%c0_6, %c0_7], %10 {strides = array<i32>} : memref<16x12xf32, #tpu.memory_space<vmem>>, vector<16x8xf32>,
    %12 = vector.extract_strided_slice %5 {offsets = [0, 15], sizes = [16, 2], strides = [1, 1]} : vector<16x17xf32> to vector<16x2xf32>
    %c0_8 = arith.constant 0 : index
    %c10 = arith.constant 10 : index
    %13 = vector.load %arg3[%c0_8, %c10] : memref<16x12xf32, #tpu.memory_space<vmem>>, vector<16x2xf32>
    tpu.vector_store %arg3[%c0_8, %c10], %12 {strides = array<i32>} : memref<16x12xf32, #tpu.memory_space<vmem>>, vector<16x2xf32>,
    %14 = vector.extract_strided_slice %5 {offsets = [0, 8], sizes = [8, 3], strides = [1, 1]} : vector<16x17xf32> to vector<8x3xf32>
    %15 = vector.extract_strided_slice %5 {offsets = [0, 11], sizes = [8, 4], strides = [1, 1]} : vector<16x17xf32> to vector<8x4xf32>
    %cst_9 = arith.constant dense<0xFF800000> : vector<3xf32>
    %16 = vector.multi_reduction <maximumf>, %14, %cst_9 [0] : vector<8x3xf32> to vector<3xf32>
    %17 = vector.shape_cast %16 : vector<3xf32> to vector<1x3xf32>
    %18 = vector.broadcast %17 : vector<1x3xf32> to vector<8x3xf32>
    %19 = arith.subf %14, %18 : vector<8x3xf32>
    %20 = math.exp %19 : vector<8x3xf32>
    %cst_10 = arith.constant dense<0.000000e+00> : vector<3xf32>
    %21 = vector.multi_reduction <add>, %20, %cst_10 [0] : vector<8x3xf32> to vector<3xf32>
    %22 = vector.shape_cast %21 : vector<3xf32> to vector<1x3xf32>
    %23 = math.log %22 : vector<1x3xf32>
    %24 = arith.addf %17, %23 : vector<1x3xf32>
    %25 = vector.broadcast %24 : vector<1x3xf32> to vector<8x3xf32>
    %26 = arith.subf %14, %25 : vector<8x3xf32>
    %27 = tpu.iota {dimensions = array<i32: 1>} : vector<8x3xi32>
    %cst_11 = arith.constant dense<0xFF800000> : vector<8xf32>
    %28 = vector.multi_reduction <maximumf>, %26, %cst_11 [1] : vector<8x3xf32> to vector<8xf32>
    %29 = vector.shape_cast %28 : vector<8xf32> to vector<8x1xf32>
    %30 = vector.broadcast %29 : vector<8x1xf32> to vector<8x3xf32>
    %31 = arith.cmpf oeq, %26, %30 : vector<8x3xf32>
    %c3_i32 = arith.constant 3 : i32
    %32 = vector.broadcast %c3_i32 : i32 to vector<8x3xi32>
    %33 = arith.select %31, %27, %32 : vector<8x3xi1>, vector<8x3xi32>
    %cst_12 = arith.constant dense<2147483647> : vector<8xi32>
    %34 = vector.multi_reduction <minsi>, %33, %cst_12 [1] : vector<8x3xi32> to vector<8xi32>
    %35 = vector.shape_cast %34 : vector<8xi32> to vector<8x1xi32>
    %36 = arith.sitofp %35 : vector<8x1xi32> to vector<8x1xf32>
    %c0_13 = arith.constant 0 : index
    %c8 = arith.constant 8 : index
    %37 = vector.load %arg3[%c0_13, %c8] : memref<16x12xf32, #tpu.memory_space<vmem>>, vector<8x1xf32>
    tpu.vector_store %arg3[%c0_13, %c8], %36 {strides = array<i32>} : memref<16x12xf32, #tpu.memory_space<vmem>>, vector<8x1xf32>,
    %cst_14 = arith.constant dense<0xFF800000> : vector<4xf32>
    %38 = vector.multi_reduction <maximumf>, %15, %cst_14 [0] : vector<8x4xf32> to vector<4xf32>
    %39 = vector.shape_cast %38 : vector<4xf32> to vector<1x4xf32>
    %40 = vector.broadcast %39 : vector<1x4xf32> to vector<8x4xf32>
    %41 = arith.subf %15, %40 : vector<8x4xf32>
    %42 = math.exp %41 : vector<8x4xf32>
    %cst_15 = arith.constant dense<0.000000e+00> : vector<4xf32>
    %43 = vector.multi_reduction <add>, %42, %cst_15 [0] : vector<8x4xf32> to vector<4xf32>
    %44 = vector.shape_cast %43 : vector<4xf32> to vector<1x4xf32>
    %45 = math.log %44 : vector<1x4xf32>
    %46 = arith.addf %39, %45 : vector<1x4xf32>
    %47 = vector.broadcast %46 : vector<1x4xf32> to vector<8x4xf32>
    %48 = arith.subf %15, %47 : vector<8x4xf32>
    %49 = tpu.iota {dimensions = array<i32: 1>} : vector<8x4xi32>
    %cst_16 = arith.constant dense<0xFF800000> : vector<8xf32>
    %50 = vector.multi_reduction <maximumf>, %48, %cst_16 [1] : vector<8x4xf32> to vector<8xf32>
    %51 = vector.shape_cast %50 : vector<8xf32> to vector<8x1xf32>
    %52 = vector.broadcast %51 : vector<8x1xf32> to vector<8x4xf32>
    %53 = arith.cmpf oeq, %48, %52 : vector<8x4xf32>
    %c4_i32 = arith.constant 4 : i32
    %54 = vector.broadcast %c4_i32 : i32 to vector<8x4xi32>
    %55 = arith.select %53, %49, %54 : vector<8x4xi1>, vector<8x4xi32>
    %cst_17 = arith.constant dense<2147483647> : vector<8xi32>
    %56 = vector.multi_reduction <minsi>, %55, %cst_17 [1] : vector<8x4xi32> to vector<8xi32>
    %57 = vector.shape_cast %56 : vector<8xi32> to vector<8x1xi32>
    %58 = arith.sitofp %57 : vector<8x1xi32> to vector<8x1xf32>
    %c0_18 = arith.constant 0 : index
    %c9 = arith.constant 9 : index
    %59 = vector.load %arg3[%c0_18, %c9] : memref<16x12xf32, #tpu.memory_space<vmem>>, vector<8x1xf32>
    tpu.vector_store %arg3[%c0_18, %c9], %58 {strides = array<i32>} : memref<16x12xf32, #tpu.memory_space<vmem>>, vector<8x1xf32>,
    %60 = vector.extract_strided_slice %5 {offsets = [8, 8], sizes = [8, 3], strides = [1, 1]} : vector<16x17xf32> to vector<8x3xf32>
    %61 = vector.extract_strided_slice %5 {offsets = [8, 11], sizes = [8, 4], strides = [1, 1]} : vector<16x17xf32> to vector<8x4xf32>
    %cst_19 = arith.constant dense<0xFF800000> : vector<3xf32>
    %62 = vector.multi_reduction <maximumf>, %60, %cst_19 [0] : vector<8x3xf32> to vector<3xf32>
    %63 = vector.shape_cast %62 : vector<3xf32> to vector<1x3xf32>
    %64 = vector.broadcast %63 : vector<1x3xf32> to vector<8x3xf32>
    %65 = arith.subf %60, %64 : vector<8x3xf32>
    %66 = math.exp %65 : vector<8x3xf32>
    %cst_20 = arith.constant dense<0.000000e+00> : vector<3xf32>
    %67 = vector.multi_reduction <add>, %66, %cst_20 [0] : vector<8x3xf32> to vector<3xf32>
    %68 = vector.shape_cast %67 : vector<3xf32> to vector<1x3xf32>
    %69 = math.log %68 : vector<1x3xf32>
    %70 = arith.addf %63, %69 : vector<1x3xf32>
    %71 = vector.broadcast %70 : vector<1x3xf32> to vector<8x3xf32>
    %72 = arith.subf %60, %71 : vector<8x3xf32>
    %73 = tpu.iota {dimensions = array<i32: 1>} : vector<8x3xi32>
    %cst_21 = arith.constant dense<0xFF800000> : vector<8xf32>
    %74 = vector.multi_reduction <maximumf>, %72, %cst_21 [1] : vector<8x3xf32> to vector<8xf32>
    %75 = vector.shape_cast %74 : vector<8xf32> to vector<8x1xf32>
    %76 = vector.broadcast %75 : vector<8x1xf32> to vector<8x3xf32>
    %77 = arith.cmpf oeq, %72, %76 : vector<8x3xf32>
    %c3_i32_22 = arith.constant 3 : i32
    %78 = vector.broadcast %c3_i32_22 : i32 to vector<8x3xi32>
    %79 = arith.select %77, %73, %78 : vector<8x3xi1>, vector<8x3xi32>
    %cst_23 = arith.constant dense<2147483647> : vector<8xi32>
    %80 = vector.multi_reduction <minsi>, %79, %cst_23 [1] : vector<8x3xi32> to vector<8xi32>
    %81 = vector.shape_cast %80 : vector<8xi32> to vector<8x1xi32>
    %82 = arith.sitofp %81 : vector<8x1xi32> to vector<8x1xf32>
    %c8_24 = arith.constant 8 : index
    %c8_25 = arith.constant 8 : index
    %83 = vector.load %arg3[%c8_24, %c8_25] : memref<16x12xf32, #tpu.memory_space<vmem>>, vector<8x1xf32>
    tpu.vector_store %arg3[%c8_24, %c8_25], %82 {strides = array<i32>} : memref<16x12xf32, #tpu.memory_space<vmem>>, vector<8x1xf32>,
    %cst_26 = arith.constant dense<0xFF800000> : vector<4xf32>
    %84 = vector.multi_reduction <maximumf>, %61, %cst_26 [0] : vector<8x4xf32> to vector<4xf32>
    %85 = vector.shape_cast %84 : vector<4xf32> to vector<1x4xf32>
    %86 = vector.broadcast %85 : vector<1x4xf32> to vector<8x4xf32>
    %87 = arith.subf %61, %86 : vector<8x4xf32>
    %88 = math.exp %87 : vector<8x4xf32>
    %cst_27 = arith.constant dense<0.000000e+00> : vector<4xf32>
    %89 = vector.multi_reduction <add>, %88, %cst_27 [0] : vector<8x4xf32> to vector<4xf32>
    %90 = vector.shape_cast %89 : vector<4xf32> to vector<1x4xf32>
    %91 = math.log %90 : vector<1x4xf32>
    %92 = arith.addf %85, %91 : vector<1x4xf32>
    %93 = vector.broadcast %92 : vector<1x4xf32> to vector<8x4xf32>
    %94 = arith.subf %61, %93 : vector<8x4xf32>
    %95 = tpu.iota {dimensions = array<i32: 1>} : vector<8x4xi32>
    %cst_28 = arith.constant dense<0xFF800000> : vector<8xf32>
    %96 = vector.multi_reduction <maximumf>, %94, %cst_28 [1] : vector<8x4xf32> to vector<8xf32>
    %97 = vector.shape_cast %96 : vector<8xf32> to vector<8x1xf32>
    %98 = vector.broadcast %97 : vector<8x1xf32> to vector<8x4xf32>
    %99 = arith.cmpf oeq, %94, %98 : vector<8x4xf32>
    %c4_i32_29 = arith.constant 4 : i32
    %100 = vector.broadcast %c4_i32_29 : i32 to vector<8x4xi32>
    %101 = arith.select %99, %95, %100 : vector<8x4xi1>, vector<8x4xi32>
    %cst_30 = arith.constant dense<2147483647> : vector<8xi32>
    %102 = vector.multi_reduction <minsi>, %101, %cst_30 [1] : vector<8x4xi32> to vector<8xi32>
    %103 = vector.shape_cast %102 : vector<8xi32> to vector<8x1xi32>
    %104 = arith.sitofp %103 : vector<8x1xi32> to vector<8x1xf32>
    %c8_31 = arith.constant 8 : index
    %c9_32 = arith.constant 9 : index
    %105 = vector.load %arg3[%c8_31, %c9_32] : memref<16x12xf32, #tpu.memory_space<vmem>>, vector<8x1xf32>
    tpu.vector_store %arg3[%c8_31, %c9_32], %104 {strides = array<i32>} : memref<16x12xf32, #tpu.memory_space<vmem>>, vector<8x1xf32>,
    return
  }
}

</mosaic_0001>

<bundles_post_ra>
// kernel: tpu_custom_call.1
= control target key start
LH: loop header
LB: loop body
LE: loop exit
PB: predicated region body
PF: predicated region fallthrough
CT: control target
= control target key end

     0   :  { %vm28_vm0 = vcmask 261120   ;;  %s503_s0 = inlined_call_operand.vmem [shape: f32[16,32], index: 0, kind: input, shape index: {}]   ;;  %s504_s1 = inlined_call_operand.vmem [shape: f32[32,17], index: 1, kind: input, shape index: {}]   ;;  %s505_s2 = inlined_call_operand.vmem [shape: f32[1,17], index: 2, kind: input, shape index: {}]   ;;  %s506_s3 = inlined_call_operand.hbm [shape: f32[16,12], index: 3, kind: output, shape index: {}]  }
   0x1   :  { %v17_v0 = vld [vmem:[%s504_s1] sm:$0xff]  ;;  %v18_v1 = vld [vmem:[%s504_s1 + $0x8] sm:$0xff]  ;;  %v19_v2 = vld [vmem:[%s504_s1 + $0x10] sm:$0xff] }
   0x2   :  { %v350_v3 = vpack.c.bf16 %v18_v1, %v17_v0  ;;  %v20_v4 = vld [vmem:[%s504_s1 + $0x18] sm:$0xff]  ;;  %v15_v5 = vld [vmem:[%s503_s0] sm:$0xff] }
   0x3   :  { %v354_v6 = vpack.c.bf16 %v20_v4, %v19_v2  ;;  %347 = vmatprep.mubr.msk.f32.mxu0 %vm28_vm0, %v15_v5 }
   0x4   :  { %8 = vsyncpa [#allocation3], 0  ;;  %351 = vmatprep.subr.bf16.mxu0 %v350_v3  ;;  %v16_v7 = vld [vmem:[%s503_s0 + $0x8] sm:$0xff]  ;;  %v328_v8 = vld [vmem:[%s505_s2] ss:$0 sm:$0xff]  ;;  %vm179_vm1 = vcmask 121944  }
   0x5   :  { %353 = vmatpush3.bf16.msra.mxu0 %v350_v3  ;;  %vm130_vm2 = vcmask 89152   ;;  %vm116_vm4 = vcmask 64512   ;;  %v404_v21 = vmov 0.0   ;;  %s405_s0 = smov 11   ;;  %s406_s1 = smov 8   ;;  %vm127_vm14 = vcmask 97360  }
   0x6   :  { %355 = vmatprep.subr.bf16.mxu0 %v354_v6  ;;  %s407_s2 = smov 123   ;;  %s408_s26 = smov [#allocation2]   ;;  %vm177_vm15 = vcmask 72768  }
   0x7   :  { %s317_s27 = sshll.u32 %s408_s26, 4  ;;  %s318_s27 = int_to_ptr.vmem [resolvable:$true] %s317_s27 }
   0x8   :  { %s380_s28 = scalar_lea.vmem %s318_s27, 256  ;;  %p385_p1 = scmp.lt.s32.totalorder %s318_s27, %s318_s27 }
   0x9   :  { %357 = vmatpush3.bf16.msra.mxu0 %v354_v6  ;;  %p381_p0 = scmp.ne.s32.totalorder %s318_s27, %s380_s28  ;;  %p386_p2 = scmp.lt.s32.totalorder %s380_s28, %s380_s28 }
   0xb   :  { %p387_p3 = por %p386_p2, %p385_p1 }
   0xc   :  { %348 = vmatmul.mubr.msk.f32.vlgmr.msra.gmra.mrb[0].mxu0 %vm28_vm0, %v16_v7  ;;  %vm224_vm0 = vcmask 80968  }
   0xd   :  { %p388_p4 = pnand %p387_p3, %p381_p0 }
  0xdf   :  { %v349_v9 = vpop.f32.mrb[0].mxu0 }
  0xe0   :  { %v451_v10 = vadd.f32 %v349_v9, %v328_v8  ;;  %v101_v11 = vpop.f32.mrb[1].mxu0 }
  0xe1   :  { %v453_v12 = vadd.f32 %v328_v8, %v101_v11 }
  0xe2   :  { %v269_v13 = vsel %vm179_vm1, %v451_v10, -inf  ;;  %v226_v14 = vsel %vm130_vm2, %v451_v10, -inf  ;;  %vm111_vm3 = vcmp.gt.f32.partialorder %v451_v10, 0.0 }
  0xe3   :  { %v270_v15 = vrot.slane %v269_v13, 4  ;;  %v227_v16 = vrot.slane %v226_v14, 4  ;;  %v180_v17 = vsel %vm179_vm1, %v453_v12, -inf  ;;  %v131_v18 = vsel %vm130_vm2, %v453_v12, -inf }
  0xe4   :  { %v181_v19 = vrot.slane %v180_v17, 4  ;;  %v132_v20 = vrot.slane %v131_v18, 4  ;;  %v332_v22 = vsel %vm111_vm3, 1.0, %v404_v21  ;;  %vm110_vm5 = vcmp.gt.f32.partialorder %v453_v12, 0.0 }
  0xe5   :  { %v271_v23 = vmax.f32 %v269_v13, %v270_v15  ;;  %v228_v24 = vmax.f32 %v226_v14, %v227_v16  ;;  %118 = vst.msk [vmem:[#allocation2 + $0x8] sm:$0xff] %vm116_vm4, %v332_v22  ;;  %v331_v25 = vsel %vm110_vm5, 1.0, %v404_v21 }
  0xe6   :  { %v182_v26 = vmax.f32 %v180_v17, %v181_v19  ;;  %v133_v27 = vmax.f32 %v131_v18, %v132_v20  ;;  %117 = vst.msk [vmem:[#allocation2] sm:$0xff] %vm116_vm4, %v331_v25 }
  0xe7   :  { %v272_v28 = vrot.slane %v271_v23, 2  ;;  %v229_v29 = vrot.slane %v228_v24, 2 }
  0xe8   :  { %v183_v30 = vrot.slane %v182_v26, 2  ;;  %v134_v31 = vrot.slane %v133_v27, 2 }
  0xe9   :  { %v273_v32 = vmax.f32 %v271_v23, %v272_v28  ;;  %v230_v33 = vmax.f32 %v228_v24, %v229_v29 }
  0xea   :  { %v184_v34 = vmax.f32 %v182_v26, %v183_v30  ;;  %v135_v35 = vmax.f32 %v133_v27, %v134_v31 }
  0xeb   :  { %v274_v36 = vrot.slane %v273_v32, 1  ;;  %v231_v37 = vrot.slane %v230_v33, 1 }
  0xec   :  { %v185_v38 = vrot.slane %v184_v34, 1  ;;  %v136_v39 = vrot.slane %v135_v35, 1 }
  0xed   :  { %v275_v40 = vmax.f32 %v273_v32, %v274_v36  ;;  %v232_v41 = vmax.f32 %v230_v33, %v231_v37 }
  0xee   :  { %v186_v42 = vmax.f32 %v184_v34, %v185_v38  ;;  %v137_v43 = vmax.f32 %v135_v35, %v136_v39 }
  0xef   :  { %v276_v44 = vsub.f32 %v451_v10, %v275_v40  ;;  %v233_v45 = vsub.f32 %v451_v10, %v232_v41 }
  0xf0   :  { %v187_v46 = vsub.f32 %v453_v12, %v186_v42  ;;  %v138_v47 = vsub.f32 %v453_v12, %v137_v43 }
  0xf1   :  { %v277_v48 = vmul.f32 1.442695, %v276_v44  ;;  %v234_v49 = vmul.f32 1.442695, %v233_v45 }
  0xf2   :  { %v188_v50 = vmul.f32 1.442695, %v187_v46  ;;  %v139_v51 = vmul.f32 1.442695, %v138_v47 }
  0xf3   :  { %364 = vpow2.f32 %v277_v48 }
  0xf4   :  { %366 = vpow2.f32 %v234_v49 }
  0xf5   :  { %368 = vpow2.f32 %v188_v50 }
  0xf6   :  { %370 = vpow2.f32 %v139_v51 }
  0xfd   :  { %v365_v52 = vpop.eup %364 }
  0xfe   :  { %v367_v53 = vpop.eup %366  ;;  %v279_v54 = vsel %vm179_vm1, %v365_v52, 0.0 }
  0xff   :  { %v369_v55 = vpop.eup %368  ;;  %v280_v56 = vrot.slane %v279_v54, 4  ;;  %v236_v57 = vsel %vm130_vm2, %v367_v53, 0.0 }
 0x100   :  { %v371_v58 = vpop.eup %370  ;;  %v237_v59 = vrot.slane %v236_v57, 4  ;;  %v190_v60 = vsel %vm179_vm1, %v369_v55, 0.0 }
 0x101   :  { %v281_v61 = vadd.f32 %v280_v56, %v279_v54  ;;  %v191_v62 = vrot.slane %v190_v60, 4  ;;  %v141_v63 = vsel %vm130_vm2, %v371_v58, 0.0 }
 0x102   :  { %v238_v0 = vadd.f32 %v237_v59, %v236_v57  ;;  %v142_v1 = vrot.slane %v141_v63, 4 }
 0x103   :  { %v282_v2 = vrot.slane %v281_v61, 2  ;;  %v192_v3 = vadd.f32 %v191_v62, %v190_v60 }
 0x104   :  { %v239_v4 = vrot.slane %v238_v0, 2  ;;  %v143_v5 = vadd.f32 %v142_v1, %v141_v63 }
 0x105   :  { %v283_v6 = vadd.f32 %v282_v2, %v281_v61  ;;  %v193_v7 = vrot.slane %v192_v3, 2 }
 0x106   :  { %v240_v8 = vadd.f32 %v239_v4, %v238_v0  ;;  %v144_v9 = vrot.slane %v143_v5, 2 }
 0x107   :  { %v284_v11 = vrot.slane %v283_v6, 1  ;;  %v194_v13 = vadd.f32 %v193_v7, %v192_v3 }
 0x108   :  { %v241_v14 = vrot.slane %v240_v8, 1  ;;  %v145_v15 = vadd.f32 %v144_v9, %v143_v5 }
 0x109   :  { %v285_v16 = vadd.f32 %v284_v11, %v283_v6  ;;  %v195_v17 = vrot.slane %v194_v13, 1 }
 0x10a   :  { %v242_v18 = vadd.f32 %v241_v14, %v240_v8  ;;  %v146_v19 = vrot.slane %v145_v15, 1 }
 0x10b   :  { %372 = vlog2.f32 %v285_v16  ;;  %v196_v20 = vadd.f32 %v195_v17, %v194_v13 }
 0x10c   :  { %374 = vlog2.f32 %v242_v18  ;;  %v147_v21 = vadd.f32 %v146_v19, %v145_v15 }
 0x10d   :  { %376 = vlog2.f32 %v196_v20 }
 0x10e   :  { %378 = vlog2.f32 %v147_v21 }
 0x115   :  { %v373_v22 = vpop.eup %372 }
 0x116   :  { %v375_v23 = vpop.eup %374  ;;  %v287_v24 = vmul.f32 0.6931472, %v373_v22 }
 0x117   :  { %v377_v25 = vpop.eup %376  ;;  %v244_v26 = vmul.f32 0.6931472, %v375_v23 }
 0x118   :  { %v379_v27 = vpop.eup %378  ;;  %v288_v28 = vadd.f32 %v287_v24, %v275_v40  ;;  %v198_v29 = vmul.f32 0.6931472, %v377_v25 }
 0x119   :  { %v245_v30 = vadd.f32 %v244_v26, %v232_v41  ;;  %v149_v31 = vmul.f32 0.6931472, %v379_v27 }
 0x11a   :  { %v289_v32 = vsub.f32 %v451_v10, %v288_v28  ;;  %v199_v33 = vadd.f32 %v198_v29, %v186_v42  ;;  %v152_v42 = vlaneseq }
 0x11b   :  { %v246_v34 = vsub.f32 %v451_v10, %v245_v30  ;;  %v150_v35 = vadd.f32 %v149_v31, %v137_v43 }
 0x11c   :  { %v290_v36 = vsel %vm179_vm1, %v289_v32, -inf  ;;  %v200_v37 = vsub.f32 %v453_v12, %v199_v33  ;;  %v153_v44 = vand.u32 127, %v152_v42 }
 0x11d   :  { %291 = vmax.xlane.f32.xlu1 %v290_v36  ;;  %v247_v38 = vsel %vm130_vm2, %v246_v34, -inf  ;;  %v151_v39 = vsub.f32 %v453_v12, %v150_v35 }
 0x11e   :  { %248 = vmax.xlane.f32.xlu0 %v247_v38  ;;  %v201_v40 = vsel %vm179_vm1, %v200_v37, -inf }
 0x11f   :  { %v154_v41 = vsel %vm130_vm2, %v151_v39, -inf }
 0x121   :  { %202 = vmax.xlane.f32.xlu1 %v201_v40 }
 0x122   :  { %155 = vmax.xlane.f32.xlu0 %v154_v41 }
 0x132   :  { %205 = vrot.lane.b32.xlu1 %v153_v44, %s405_s0 }
 0x138   :  { %158 = vrot.lane.b32.xlu0 %v153_v44, %s406_s1 }
 0x1aa   :  { %v292_v43 = vpop.xlane.xlu1 %291 }
 0x1ab   :  { %v249_v45 = vpop.xlane.xlu0 %248  ;;  %vm293_vm6 = vcmp.eq.f32.partialorder %v289_v32, %v292_v43 }
 0x1ac   :  { %vm250_vm8 = vcmp.eq.f32.partialorder %v246_v34, %v249_v45 }
 0x1ae   :  { %v203_v46 = vpop.xlane.xlu1 %202 }
 0x1af   :  { %v156_v47 = vpop.xlane.xlu0 %155  ;;  %vm204_vm7 = vcmp.eq.f32.partialorder %v200_v37, %v203_v46 }
 0x1b0   :  { %vm157_vm9 = vcmp.eq.f32.partialorder %v151_v39, %v156_v47 }
 0x1b2   :  { %v206_v48 = vpop.permute.xlu1 %205 }
 0x1b3   :  { %v207_v49 = vsel %vm204_vm7, %v206_v48, 4  ;;  %v294_v50 = vsel %vm293_vm6, %v206_v48, 4  ;;  %v159_v51 = vpop.permute.xlu0 %158 }
 0x1b4   :  { %v208_v52 = vsel %vm179_vm1, %v207_v49, 2147483647  ;;  %v160_v53 = vsel %vm157_vm9, %v159_v51, 3  ;;  %v251_v54 = vsel %vm250_vm8, %v159_v51, 3  ;;  %v295_v55 = vsel %vm179_vm1, %v294_v50, 2147483647 }
 0x1b5   :  { %v161_v56 = vsel %vm130_vm2, %v160_v53, 2147483647  ;;  %v252_v57 = vsel %vm130_vm2, %v251_v54, 2147483647  ;;  %v210_v62 = vshra.s32 %v208_v52, 16  ;;  %v297_v63 = vshra.s32 %v295_v55, 16 }
 0x1b6   :  { %v254_v58 = vshra.s32 %v252_v57, 16  ;;  %v163_v59 = vshra.s32 %v161_v56, 16  ;;  %v253_v2 = vand.u32 65535, %v252_v57  ;;  %v162_v3 = vand.u32 65535, %v161_v56 }
 0x1b7   :  { %v212_v0 = vcvt.s32.f32 %v210_v62  ;;  %v299_v1 = vcvt.s32.f32 %v297_v63  ;;  %v296_v8 = vand.u32 65535, %v295_v55  ;;  %v209_v9 = vand.u32 65535, %v208_v52 }
 0x1b8   :  { %v256_v60 = vcvt.s32.f32 %v254_v58  ;;  %v165_v61 = vcvt.s32.f32 %v163_v59  ;;  %v255_v6 = vcvt.s32.f32 %v253_v2  ;;  %v164_v7 = vcvt.s32.f32 %v162_v3 }
 0x1b9   :  { %v298_v16 = vcvt.s32.f32 %v296_v8  ;;  %v211_v17 = vcvt.s32.f32 %v209_v9 }
 0x1ba   :  { %257 = vmin.xlane.f32.xlu0 %v256_v60  ;;  %166 = vmin.xlane.f32.xlu1 %v165_v61 }
 0x1be   :  { %213 = vmin.xlane.f32.xlu0 %v212_v0  ;;  %300 = vmin.xlane.f32.xlu1 %v299_v1 }
 0x247   :  { %v258_v4 = vpop.xlane.xlu0 %257  ;;  %v167_v5 = vpop.xlane.xlu1 %166 }
 0x248   :  { %vm259_vm10 = vcmp.eq.f32.partialorder %v256_v60, %v258_v4  ;;  %vm168_vm11 = vcmp.eq.f32.partialorder %v165_v61, %v167_v5  ;;  %v264_v20 = vcvt.f32.s32 %v258_v4  ;;  %v173_v21 = vcvt.f32.s32 %v167_v5 }
 0x249   :  { %v260_v11 = vsel %vm259_vm10, %v255_v6, inf  ;;  %v169_v13 = vsel %vm168_vm11, %v164_v7, inf }
 0x24a   :  { %261 = vmin.xlane.f32.xlu1 %v260_v11  ;;  %170 = vmin.xlane.f32.xlu0 %v169_v13  ;;  %v265_v28 = vshll.u32 %v264_v20, 16  ;;  %v174_v29 = vshll.u32 %v173_v21, 16 }
 0x24b   :  { %v214_v14 = vpop.xlane.xlu0 %213  ;;  %v301_v15 = vpop.xlane.xlu1 %300 }
 0x24c   :  { %vm302_vm12 = vcmp.eq.f32.partialorder %v299_v1, %v301_v15  ;;  %vm215_vm13 = vcmp.eq.f32.partialorder %v212_v0, %v214_v14  ;;  %v220_v24 = vcvt.f32.s32 %v214_v14  ;;  %v307_v25 = vcvt.f32.s32 %v301_v15 }
 0x24d   :  { %v303_v18 = vsel %vm302_vm12, %v298_v16, inf  ;;  %v216_v19 = vsel %vm215_vm13, %v211_v17, inf }
 0x24e   :  { %304 = vmin.xlane.f32.xlu1 %v303_v18  ;;  %217 = vmin.xlane.f32.xlu0 %v216_v19  ;;  %v221_v34 = vshll.u32 %v220_v24, 16  ;;  %v308_v35 = vshll.u32 %v307_v25, 16 }
 0x25f   :  { %123 = vrot.lane.b32.xlu1 %v451_v10, %s407_s2 }
 0x264   :  { %121 = vrot.lane.b32.xlu0 %v453_v12, %s407_s2 }
 0x2d7   :  { %v262_v22 = vpop.xlane.xlu1 %261  ;;  %v171_v23 = vpop.xlane.xlu0 %170 }
 0x2d8   :  { %v263_v26 = vcvt.f32.s32 %v262_v22  ;;  %v172_v27 = vcvt.f32.s32 %v171_v23 }
 0x2da   :  { %v266_v30 = vadd.s32 %v265_v28, %v263_v26  ;;  %v175_v31 = vadd.s32 %v174_v29, %v172_v27 }
 0x2db   :  { %v305_v32 = vpop.xlane.xlu1 %304  ;;  %v218_v33 = vpop.xlane.xlu0 %217 }
 0x2dc   :  { %v306_v36 = vcvt.f32.s32 %v305_v32  ;;  %v219_v10 = vcvt.f32.s32 %v218_v33  ;;  %v267_v38 = vcvt.s32.f32 %v266_v30  ;;  %v176_v39 = vcvt.s32.f32 %v175_v31 }
 0x2de   :  { %v309_v12 = vadd.s32 %v308_v35, %v306_v36  ;;  %v222_v37 = vadd.s32 %v221_v34, %v219_v10 }
 0x2df   :  { %v124_v40 = vpop.permute.xlu1 %123  ;;  %v122_v41 = vpop.permute.xlu0 %121 }
 0x2e0   :  { %v310_v42 = vcvt.s32.f32 %v309_v12  ;;  %v223_v44 = vcvt.s32.f32 %v222_v37  ;;  %129 = vst.msk [vmem:[#allocation2 + $0x8] sm:$0xff] %vm127_vm14, %v124_v40  ;;  %128 = vst.msk [vmem:[#allocation2] sm:$0xff] %vm127_vm14, %v122_v41 }
 0x2e1   :  { %268 = vst.msk [vmem:[#allocation2 + $0x8] sm:$0xff] %vm177_vm15, %v267_v38  ;;  %178 = vst.msk [vmem:[#allocation2] sm:$0xff] %vm177_vm15, %v176_v39 }
 0x2e2   :  { %311 = vst.msk [vmem:[#allocation2 + $0x8] sm:$0xff] %vm224_vm0, %v310_v42  ;;  %225 = vst.msk [vmem:[#allocation2] sm:$0xff] %vm224_vm0, %v223_v44 }
 0x2e3   :  { %391 = shalt.err (!%p388_p4)
}
 0x2e4   :  { %s392_s4 = scalar_lea.hbm %s506_s3, 256 }
 0x2e5   :  { %p393_p5 = scmp.ne.s32.totalorder %s506_s3, %s392_s4  ;;  %p396_p6 = scmp.lt.u32.totalorder %s392_s4, %s506_s3 }
 0x2e7   :  { %p398_p7 = pnand %p396_p6, %p393_p5 }
 0x2e9   :  { %401 = shalt.err (!%p398_p7)
}
 0x2ea   :  { %s409_s9 = smov 128  }
 0x2eb   :  { %323 = dma.vmem_to_hbm [thread:$0]  %s318_s27, 256, %s506_s3, [#allocation3], %s409_s9, %s409_s9, %s406_s1  }
 0x2ec   :  { %402 = dma.done.wait [#allocation3], 256  }
 0x2ed   :  { %403 = vsyncadd [#allocation3], 4294967040 }
 0x2ee   :  { %327 = vsyncpa [#allocation3], 1 }

</bundles_post_ra>
